<compile_context>
chip_gen: v7x
topology: tpu7x:2x2x1
jax: 0.10.0
libtpu: 0.0.40
codegen_flags: <defaults>
</compile_context>

<pallas_src>
import jax
import jax.numpy as jnp
from jax.experimental import pallas as pl
from jax.experimental.pallas import tpu as pltpu

BOARD_SIZE = 64
IN_DIM = BOARD_SIZE * 2   # 128
HID_DIM = 128
OUT_DIM = BOARD_SIZE      # 64


def _round_up(x, m):
    return ((x + m - 1) // m) * m


def othello_mlp_kernel(x_ref, w1_ref, b1_ref, w2_ref, b2_ref, o_ref):
    # In-kernel cast to bf16 for the MXU (f32 accumulation).
    x = x_ref[...].astype(jnp.bfloat16)

    # fc1 + bias + ReLU
    h = jnp.dot(x, w1_ref[...], preferred_element_type=jnp.float32)
    h = jnp.maximum(h + b1_ref[...], 0.0)

    # fc2 (real 64 output lanes, no padding)
    logits = jnp.dot(h.astype(jnp.bfloat16), w2_ref[...],
                     preferred_element_type=jnp.float32)
    logits = logits + b2_ref[...]

    # numerically-stable softmax over the last (64-wide) dim
    m = jnp.max(logits, axis=-1, keepdims=True)
    e = jnp.exp(logits - m)
    denom = jnp.sum(e, axis=-1, keepdims=True)
    o_ref[...] = (e * pl.reciprocal(denom, approx=True)).astype(o_ref.dtype)


def prepare_params(w1_t, b1, w2_t, b2):
    """One-time (out-of-forward-path) weight prep: bf16 matmul weights,
    f32 row-vector biases."""
    return (
        w1_t.astype(jnp.bfloat16),                      # (128, 128)
        b1.reshape(1, HID_DIM).astype(jnp.float32),     # (1, 128)
        w2_t.astype(jnp.bfloat16),                      # (128, 64)
        b2.reshape(1, OUT_DIM).astype(jnp.float32),     # (1, 64)
    )


def _batch_dim_semantics(grid_b):
    """CORE_PARALLEL on v7x (2 TensorCores/chip) when the batch grid splits
    evenly across both cores; plain "parallel" on v5e/v6e or odd grids."""
    try:
        kind = jax.devices()[0].device_kind.lower()
    except Exception:  # pragma: no cover - defensive
        kind = ""
    if ("v7" in kind or "tpu7" in kind) and grid_b % 2 == 0:
        return (pltpu.CORE_PARALLEL,)
    return ("parallel",)


def othello_nn_forward(x, params, *, block_b=4096):
    """OthelloNN forward.

    x:      (B, 128) float32 (cast to bf16 inside the kernel)
    params: output of prepare_params(...)
    returns (B, 64) float32 softmax probabilities.
    """
    w1_bf, b1_f, w2_bf, b2_f = params
    B = x.shape[0]

    # Pad only to the sublane multiple (<= 7 rows), never to a tile multiple.
    b_pad = _round_up(max(B, 1), 8)
    if b_pad != B:
        x = jnp.pad(x, ((0, b_pad - B), (0, 0)))

    # Batch tile: multiple of 8, capped at the (aligned) batch size.
    tb = max(8, (min(block_b, b_pad) // 8) * 8)
    grid_b = pl.cdiv(b_pad, tb)   # ragged last block is masked by Pallas

    cost = pl.CostEstimate(
        flops=2 * b_pad * (IN_DIM * HID_DIM + HID_DIM * OUT_DIM),
        transcendentals=b_pad * OUT_DIM,
        bytes_accessed=(b_pad * IN_DIM * 4        # x (f32)
                        + b_pad * OUT_DIM * 4     # out (f32)
                        + IN_DIM * HID_DIM * 2    # w1 (bf16)
                        + HID_DIM * OUT_DIM * 2   # w2 (bf16)
                        + HID_DIM * 4 + OUT_DIM * 4),
    )

    out = pl.pallas_call(
        othello_mlp_kernel,
        out_shape=jax.ShapeDtypeStruct((b_pad, OUT_DIM), jnp.float32),
        grid=(grid_b,),
        in_specs=[
            pl.BlockSpec((tb, IN_DIM), lambda i: (i, 0)),        # x: batch-tiled
            pl.BlockSpec((IN_DIM, HID_DIM), lambda i: (0, 0)),   # w1: resident
            pl.BlockSpec((1, HID_DIM), lambda i: (0, 0)),        # b1: resident
            pl.BlockSpec((HID_DIM, OUT_DIM), lambda i: (0, 0)),  # w2: resident
            pl.BlockSpec((1, OUT_DIM), lambda i: (0, 0)),        # b2: resident
        ],
        out_specs=pl.BlockSpec((tb, OUT_DIM), lambda i: (i, 0)),
        compiler_params=pltpu.CompilerParams(
            dimension_semantics=_batch_dim_semantics(grid_b)),
        cost_estimate=cost,
    )(x, w1_bf, b1_f, w2_bf, b2_f)

    # Drop the (<= 7 row) sublane padding only when it was added.
    return out[:B] if b_pad != B else out


def init_params(key):
    """Deterministic synthetic init matching nn.Linear shapes.

    PyTorch stores Linear weight as (out_features, in_features); we transpose
    to (in, out) for the x @ W convention used in the kernel.
    """
    k1, k2, k3, k4 = jax.random.split(key, 4)
    bound1 = 1.0 / jnp.sqrt(IN_DIM)
    bound2 = 1.0 / jnp.sqrt(HID_DIM)
    w1 = jax.random.uniform(k1, (HID_DIM, IN_DIM), jnp.float32, -bound1, bound1)
    b1 = jax.random.uniform(k2, (HID_DIM,), jnp.float32, -bound1, bound1)
    w2 = jax.random.uniform(k3, (OUT_DIM, HID_DIM), jnp.float32, -bound2, bound2)
    b2 = jax.random.uniform(k4, (OUT_DIM,), jnp.float32, -bound2, bound2)
    return (
        w1.T,                      # (128, 128)
        b1.reshape(1, HID_DIM),    # (1, 128)
        w2.T,                      # (128, 64)
        b2.reshape(1, OUT_DIM),    # (1, 64)
    )


def _reference(x, w1_t, b1, w2_t, b2):
    """Plain-JAX reference with the same bf16-in / f32-acc numerics."""
    xb = x.astype(jnp.bfloat16)
    w1b = w1_t.astype(jnp.bfloat16)
    w2b = w2_t.astype(jnp.bfloat16)
    h = jnp.maximum(
        jnp.dot(xb, w1b, preferred_element_type=jnp.float32) + b1, 0.0)
    logits = jnp.dot(h.astype(jnp.bfloat16), w2b,
                     preferred_element_type=jnp.float32) + b2
    return jax.nn.softmax(logits, axis=-1)


if __name__ == "__main__":
    key = jax.random.PRNGKey(0)
    kx, kp, kx2 = jax.random.split(key, 3)

    raw_params = init_params(kp)
    params = prepare_params(*raw_params)   # one-time weight prep

    # Small single-tile case (B=2, padded to one 8-row sublane group).
    B = 2
    x = jax.random.normal(kx, (B, IN_DIM), dtype=jnp.float32)
    out = jax.block_until_ready(othello_nn_forward(x, params))
    ref = _reference(x, *raw_params)
    assert out.shape == (B, OUT_DIM)
    assert jnp.allclose(out, ref, atol=1e-3, rtol=1e-2)
    assert jnp.allclose(jnp.sum(out, axis=-1), 1.0, atol=5e-3)

    # Multi-tile case (B=20 -> b_pad=24, block_b=8 -> grid of 3) to exercise
    # the pipelined batch loop.
    B2 = 20
    x2 = jax.random.normal(kx2, (B2, IN_DIM), dtype=jnp.float32)
    out2 = jax.block_until_ready(othello_nn_forward(x2, params, block_b=8))
    ref2 = _reference(x2, *raw_params)
    assert out2.shape == (B2, OUT_DIM)
    assert jnp.allclose(out2, ref2, atol=1e-3, rtol=1e-2)
    assert jnp.allclose(jnp.sum(out2, axis=-1), 1.0, atol=5e-3)

    print("KERNEL_OK")
</pallas_src>

<mosaic_0001>
module attributes {stable_mosaic.version = 11 : i64} {
  func.func @othello_mlp_kernel(%arg0: i32, %arg1: memref<8x128xf32, #tpu.memory_space<vmem>>, %arg2: memref<128x128xbf16, #tpu.memory_space<vmem>>, %arg3: memref<1x128xf32, #tpu.memory_space<vmem>>, %arg4: memref<128x64xbf16, #tpu.memory_space<vmem>>, %arg5: memref<1x64xf32, #tpu.memory_space<vmem>>, %arg6: memref<8x64xf32, #tpu.memory_space<vmem>>) attributes {dimension_semantics = [#tpu.dimension_semantics<parallel>], iteration_bounds = array<i64: 1>, scalar_prefetch = 0 : i64, scratch_operands = 0 : i64, tpu.core_type = #tpu.core_type<tc>, window_params = [{transform_indices = @transform_0, window_bounds = array<i64: 8, 128>}, {pipeline_mode = #tpu.pipeline_mode<synchronous>, transform_indices = @transform_1, window_bounds = array<i64: 128, 128>}, {pipeline_mode = #tpu.pipeline_mode<synchronous>, transform_indices = @transform_2, window_bounds = array<i64: 1, 128>}, {pipeline_mode = #tpu.pipeline_mode<synchronous>, transform_indices = @transform_3, window_bounds = array<i64: 128, 64>}, {pipeline_mode = #tpu.pipeline_mode<synchronous>, transform_indices = @transform_4, window_bounds = array<i64: 1, 64>}, {transform_indices = @transform_5, window_bounds = array<i64: 8, 64>}]} {
    %c0 = arith.constant 0 : index
    %c0_0 = arith.constant 0 : index
    %0 = vector.load %arg1[%c0, %c0_0] : memref<8x128xf32, #tpu.memory_space<vmem>>, vector<8x128xf32>
    %1 = arith.truncf %0 : vector<8x128xf32> to vector<8x128xbf16>
    %c0_1 = arith.constant 0 : index
    %c0_2 = arith.constant 0 : index
    %2 = vector.load %arg2[%c0_1, %c0_2] : memref<128x128xbf16, #tpu.memory_space<vmem>>, vector<128x128xbf16>
    %cst = arith.constant dense<0.000000e+00> : vector<8x128xf32>
    %3 = tpu.matmul %1, %2, %cst {dimension_numbers = #tpu.dot_dimension_numbers<[1], [0], [0], [1], [0, 0, 1, 1], [], []>} : vector<8x128xbf16>, vector<128x128xbf16>, vector<8x128xf32> -> vector<8x128xf32>
    %c0_3 = arith.constant 0 : index
    %c0_4 = arith.constant 0 : index
    %4 = vector.load %arg3[%c0_3, %c0_4] : memref<1x128xf32, #tpu.memory_space<vmem>>, vector<1x128xf32>
    %5 = vector.broadcast %4 : vector<1x128xf32> to vector<8x128xf32>
    %6 = arith.addf %3, %5 : vector<8x128xf32>
    %cst_5 = arith.constant 0.000000e+00 : f32
    %7 = vector.broadcast %cst_5 : f32 to vector<8x128xf32>
    %8 = arith.maximumf %6, %7 : vector<8x128xf32>
    %9 = arith.truncf %8 : vector<8x128xf32> to vector<8x128xbf16>
    %c0_6 = arith.constant 0 : index
    %c0_7 = arith.constant 0 : index
    %10 = vector.load %arg4[%c0_6, %c0_7] : memref<128x64xbf16, #tpu.memory_space<vmem>>, vector<128x64xbf16>
    %cst_8 = arith.constant dense<0.000000e+00> : vector<8x64xf32>
    %11 = tpu.matmul %9, %10, %cst_8 {dimension_numbers = #tpu.dot_dimension_numbers<[1], [0], [0], [1], [0, 0, 1, 1], [], []>} : vector<8x128xbf16>, vector<128x64xbf16>, vector<8x64xf32> -> vector<8x64xf32>
    %c0_9 = arith.constant 0 : index
    %c0_10 = arith.constant 0 : index
    %12 = vector.load %arg5[%c0_9, %c0_10] : memref<1x64xf32, #tpu.memory_space<vmem>>, vector<1x64xf32>
    %13 = vector.broadcast %12 : vector<1x64xf32> to vector<8x64xf32>
    %14 = arith.addf %11, %13 : vector<8x64xf32>
    %cst_11 = arith.constant dense<0xFF800000> : vector<8xf32>
    %15 = vector.multi_reduction <maximumf>, %14, %cst_11 [1] : vector<8x64xf32> to vector<8xf32>
    %16 = vector.shape_cast %15 : vector<8xf32> to vector<8x1xf32>
    %17 = vector.broadcast %16 : vector<8x1xf32> to vector<8x64xf32>
    %18 = arith.subf %14, %17 : vector<8x64xf32>
    %19 = math.exp %18 : vector<8x64xf32>
    %cst_12 = arith.constant dense<0.000000e+00> : vector<8xf32>
    %20 = vector.multi_reduction <add>, %19, %cst_12 [1] : vector<8x64xf32> to vector<8xf32>
    %21 = vector.shape_cast %20 : vector<8xf32> to vector<8x1xf32>
    %22 = tpu.reciprocal %21 {approx = true} : vector<8x1xf32> -> vector<8x1xf32>
    %23 = vector.broadcast %22 : vector<8x1xf32> to vector<8x64xf32>
    %24 = arith.mulf %19, %23 : vector<8x64xf32>
    %c0_13 = arith.constant 0 : index
    %c0_14 = arith.constant 0 : index
    %25 = vector.load %arg6[%c0_13, %c0_14] : memref<8x64xf32, #tpu.memory_space<vmem>>, vector<8x64xf32>
    tpu.vector_store %arg6[%c0_13, %c0_14], %24 {strides = array<i32>} : memref<8x64xf32, #tpu.memory_space<vmem>>, vector<8x64xf32>,
    return
  }
  func.func @transform_0(%arg0: i32) -> (i32, i32) {
    %c0_i32 = arith.constant 0 : i32
    %c0_i32_0 = arith.constant 0 : i32
    return %arg0, %c0_i32 : i32, i32
  }
  func.func @transform_1(%arg0: i32) -> (i32, i32) {
    %c0_i32 = arith.constant 0 : i32
    %c0_i32_0 = arith.constant 0 : i32
    %c0_i32_1 = arith.constant 0 : i32
    return %c0_i32, %c0_i32_0 : i32, i32
  }
  func.func @transform_2(%arg0: i32) -> (i32, i32) {
    %c0_i32 = arith.constant 0 : i32
    %c0_i32_0 = arith.constant 0 : i32
    %c0_i32_1 = arith.constant 0 : i32
    return %c0_i32, %c0_i32_0 : i32, i32
  }
  func.func @transform_3(%arg0: i32) -> (i32, i32) {
    %c0_i32 = arith.constant 0 : i32
    %c0_i32_0 = arith.constant 0 : i32
    %c0_i32_1 = arith.constant 0 : i32
    return %c0_i32, %c0_i32_0 : i32, i32
  }
  func.func @transform_4(%arg0: i32) -> (i32, i32) {
    %c0_i32 = arith.constant 0 : i32
    %c0_i32_0 = arith.constant 0 : i32
    %c0_i32_1 = arith.constant 0 : i32
    return %c0_i32, %c0_i32_0 : i32, i32
  }
  func.func @transform_5(%arg0: i32) -> (i32, i32) {
    %c0_i32 = arith.constant 0 : i32
    %c0_i32_0 = arith.constant 0 : i32
    return %arg0, %c0_i32 : i32, i32
  }
}

</mosaic_0001>

<bundles_post_ra>
// kernel: tpu_custom_call.1
= control target key start
LH: loop header
LB: loop body
LE: loop exit
PB: predicated region body
PF: predicated region fallthrough
CT: control target
= control target key end

     0   :  { %v398_v1 = vmov 0.0   ;;  %vm399_vm0 = vmmov 0   ;;  %s503_s0 = inlined_call_operand.vmem [shape: f32[8,128], index: 0, kind: input, shape index: {}]   ;;  %s504_s1 = inlined_call_operand.vmem [shape: bf16[128,128], index: 1, kind: input, shape index: {}]   ;;  %s505_s2 = inlined_call_operand.vmem [shape: f32[1,128], index: 2, kind: input, shape index: {}]   ;;  %s506_s3 = inlined_call_operand.vmem [shape: bf16[128,64], index: 3, kind: input, shape index: {}]   ;;  %s507_s4 = inlined_call_operand.vmem [shape: f32[1,64], index: 4, kind: input, shape index: {}]   ;;  %s508_s5 = inlined_call_operand.hbm [shape: f32[8,64], index: 5, kind: output, shape index: {}]  }
   0x1   :  { %v354_v0 = vld [vmem:[%s504_s1] sm:$0xff]   ;;  %311 = vmatprep.subr.bf16.mxu0 %v398_v1  ;;  %331 = vmatprep.subr.bf16.mxu1 %v398_v1  ;;  %v355_v2 = vld [vmem:[%s504_s1 + $0x8] sm:$0xff]   ;;  %v356_v3 = vld [vmem:[%s504_s1 + $0x10] sm:$0xff]  }
   0x2   :  { %312 = vmatpush3.bf16.msra.mxu0 %v354_v0  ;;  %327 = vmatprep.mubr.msk.bf16.mxu0 %vm399_vm0, %v398_v1  ;;  %v362_v4 = vld [vmem:[%s506_s3] sm:$0xff]   ;;  %v357_v5 = vld [vmem:[%s504_s1 + $0x18] sm:$0xff]   ;;  %v363_v6 = vld [vmem:[%s506_s3 + $0x8] sm:$0xff]  }
   0x3   :  { %313 = vmatprep.subr.bf16.mxu0 %v398_v1  ;;  %347 = vmatprep.mubr.msk.bf16.mxu1 %vm399_vm0, %v398_v1  ;;  %v358_v7 = vld [vmem:[%s504_s1 + $0x20] sm:$0xff]   ;;  %v364_v8 = vld [vmem:[%s506_s3 + $0x10] sm:$0xff]  }
   0x4   :  { %332 = vmatpush3.bf16.msra.mxu1 %v362_v4 }
   0x5   :  { %333 = vmatprep.subr.bf16.mxu1 %v398_v1 }
   0x6   :  { %314 = vmatpush3.bf16.msra.mxu0 %v355_v2 }
   0x7   :  { %315 = vmatprep.subr.bf16.mxu0 %v398_v1 }
   0x8   :  { %334 = vmatpush3.bf16.msra.mxu1 %v363_v6 }
   0x9   :  { %335 = vmatprep.subr.bf16.mxu1 %v398_v1 }
   0xa   :  { %316 = vmatpush3.bf16.msra.mxu0 %v356_v3 }
   0xb   :  { %317 = vmatprep.subr.bf16.mxu0 %v398_v1 }
   0xe   :  { %318 = vmatpush3.bf16.msra.mxu0 %v357_v5 }
   0xf   :  { %319 = vmatprep.subr.bf16.mxu0 %v398_v1 }
  0x10   :  { %10 = vsyncpa [#allocation3], 0  ;;  %v359_v9 = vld [vmem:[%s504_s1 + $0x28] sm:$0xff]   ;;  %336 = vmatpush3.bf16.msra.mxu1 %v364_v8  ;;  %v365_v10 = vld [vmem:[%s506_s3 + $0x18] sm:$0xff]   ;;  %vm248_vm1 = vcmask 523264  }
  0x11   :  { %337 = vmatprep.subr.bf16.mxu1 %v398_v1  ;;  %v360_v11 = vld [vmem:[%s504_s1 + $0x30] sm:$0xff]   ;;  %v366_v12 = vld [vmem:[%s506_s3 + $0x20] sm:$0xff]   ;;  %v361_v13 = vld [vmem:[%s504_s1 + $0x38] sm:$0xff]  }
  0x12   :  { %320 = vmatpush3.bf16.msra.mxu0 %v358_v7  ;;  %v22_v14 = vld [vmem:[%s503_s0] sm:$0xff]  ;;  %v367_v15 = vld [vmem:[%s506_s3 + $0x28] sm:$0xff]   ;;  %v368_v17 = vld [vmem:[%s506_s3 + $0x30] sm:$0xff]  }
  0x13   :  { %321 = vmatprep.subr.bf16.mxu0 %v398_v1  ;;  %v23_v16 = vpack.c.bf16 %v22_v14, %v22_v14  ;;  %v369_v18 = vld [vmem:[%s506_s3 + $0x38] sm:$0xff]   ;;  %v275_v19 = vld [vmem:[%s505_s2] ss:$0 sm:$0xff]  ;;  %s400_s2 = smov [#allocation2]  }
  0x14   :  { %338 = vmatpush3.bf16.msra.mxu1 %v365_v10  ;;  %v284_v27 = vld [vmem:[%s507_s4] ss:$0 sm:$0xff]  ;;  %s267_s3 = sshll.u32 %s400_s2, 4  ;;  %s268_s3 = int_to_ptr.vmem [resolvable:$true] %s267_s3 }
  0x15   :  { %339 = vmatprep.subr.bf16.mxu1 %v398_v1  ;;  %s374_s4 = scalar_lea.vmem %s268_s3, 128  ;;  %p379_p1 = scmp.lt.s32.totalorder %s268_s3, %s268_s3 }
  0x16   :  { %322 = vmatpush3.bf16.msra.mxu0 %v359_v9  ;;  %p375_p0 = scmp.ne.s32.totalorder %s268_s3, %s374_s4  ;;  %p380_p2 = scmp.lt.s32.totalorder %s374_s4, %s374_s4 }
  0x17   :  { %323 = vmatprep.subr.bf16.mxu0 %v398_v1 }
  0x18   :  { %340 = vmatpush3.bf16.msra.mxu1 %v366_v12  ;;  %p381_p3 = por %p380_p2, %p379_p1 }
  0x19   :  { %341 = vmatprep.subr.bf16.mxu1 %v398_v1 }
  0x1a   :  { %324 = vmatpush3.bf16.msra.mxu0 %v360_v11  ;;  %p382_p4 = pnand %p381_p3, %p375_p0 }
  0x1b   :  { %325 = vmatprep.subr.bf16.mxu0 %v398_v1 }
  0x1c   :  { %342 = vmatpush3.bf16.msra.mxu1 %v367_v15 }
  0x1d   :  { %343 = vmatprep.subr.bf16.mxu1 %v398_v1 }
  0x1e   :  { %326 = vmatpush3.bf16.msra.mxu0 %v361_v13 }
  0x20   :  { %344 = vmatpush3.bf16.msra.mxu1 %v368_v17 }
  0x21   :  { %328 = vmatmul.mubr.bf16.vlgmr.msra.gmra.mrb[0].mxu0 %v23_v16  ;;  %345 = vmatprep.subr.bf16.mxu1 %v398_v1 }
  0x24   :  { %346 = vmatpush3.bf16.msra.mxu1 %v369_v18 }
  0xf4   :  { %v129_v20 = vpop.f32.mrb[0].mxu0 }
  0xf5   :  { %v130_v21 = vadd.f32 %v275_v19, %v129_v20  ;;  %v329_v22 = vpop.f32.mrb[1].mxu0 }
  0xf6   :  { %v132_v23 = vpop.f32.mrb[2].mxu0 }
  0xf7   :  { %v135_v24 = vmax.f32 %v130_v21, 0.0  ;;  %v330_v25 = vpop.f32.mrb[3].mxu0 }
  0xf9   :  { %v136_v26 = vpack.c.bf16 %v135_v24, %v135_v24 }
  0xfb   :  { %348 = vmatmul.mubr.bf16.vlgmr.msra.gmra.mrb[0].mxu1 %v136_v26 }
 0x1ce   :  { %v242_v28 = vpop.f32.mrb[0].mxu1 }
 0x1cf   :  { %v243_v29 = vadd.f32 %v284_v27, %v242_v28  ;;  %v349_v30 = vpop.f32.mrb[1].mxu1 }
 0x1d0   :  { %v245_v31 = vpop.f32.mrb[2].mxu1 }
 0x1d1   :  { %v350_v32 = vpop.f32.mrb[3].mxu1  ;;  %v249_v33 = vsel %vm248_vm1, %v243_v29, -inf }
 0x1d2   :  { %250 = vmax.xlane.f32.xlu0 %v249_v33 }
 0x25f   :  { %v251_v34 = vpop.xlane.xlu0 %250 }
 0x260   :  { %v252_v35 = vsub.f32 %v243_v29, %v251_v34 }
 0x262   :  { %v253_v36 = vmul.f32 1.442695, %v252_v35 }
 0x264   :  { %370 = vpow2.f32 %v253_v36 }
 0x26e   :  { %v371_v37 = vpop.eup %370 }
 0x26f   :  { %v255_v38 = vsel %vm248_vm1, %v371_v37, 0.0 }
 0x270   :  { %256 = vadd.xlane.f32.xlu0 %v255_v38 }
 0x2fd   :  { %v257_v39 = vpop.xlane.xlu0 %256 }
 0x2fe   :  { %372 = vrcp.f32 %v257_v39 }
 0x308   :  { %v373_v40 = vpop.eup %372 }
 0x309   :  { %v259_v41 = vmul.f32 %v373_v40, %v371_v37 }
 0x30b   :  { %260 = vst.msk [vmem:[#allocation2] sm:$0xff] %vm248_vm1, %v259_v41 }
 0x30c   :  { %385 = shalt.err (!%p382_p4)
}
 0x30d   :  { %s386_s6 = scalar_lea.hbm %s508_s5, 128 }
 0x30e   :  { %p387_p5 = scmp.ne.s32.totalorder %s508_s5, %s386_s6  ;;  %p390_p6 = scmp.lt.u32.totalorder %s386_s6, %s508_s5 }
 0x310   :  { %p392_p7 = pnand %p390_p6, %p387_p5 }
 0x312   :  { %395 = shalt.err (!%p392_p7)
}
 0x313   :  { %270 = dma.vmem_to_hbm [thread:$0]  %s268_s3, 128, %s508_s5, [#allocation3]  }
 0x314   :  { %396 = dma.done.wait [#allocation3], 128  }
 0x315   :  { %397 = vsyncadd [#allocation3], 4294967168 }
 0x316   :  { %274 = vsyncpa [#allocation3], 1 }

</bundles_post_ra>
